<compile_context>
chip_gen: v5e
topology: v5e:2x2
jax: 0.10.0
libtpu: 0.0.40
codegen_flags: <defaults>
</compile_context>

<pallas_src>
import functools
import math

import jax
import jax.numpy as jnp
from jax import lax
from jax.experimental import pallas as pl
from jax.experimental.pallas import tpu as pltpu


def _round_up(a, b):
    return ((a + b - 1) // b) * b


def _label_smoothing_kernel(tgt_ref, x_ref, out_ref, *, padding_idx,
                            confidence, smooth_val, const_term):
    x = x_ref[...].astype(jnp.float32)          # (TN, V) log-probs
    tgt = tgt_ref[...]                          # (TN, 1) int32 labels
    tn, v = x.shape

    col = lax.broadcasted_iota(jnp.int32, (tn, v), 1)
    # x[t] per row via a masked lane reduce; full row sum; static pad column.
    x_t = jnp.sum(jnp.where(col == tgt, x, 0.0), axis=-1, keepdims=True)
    row_sum = jnp.sum(x, axis=-1, keepdims=True)
    x_pad = x[:, padding_idx:padding_idx + 1]

    # sum_j td[j]*(log(td[j]) - x[j]) with td[t]=confidence, td[pad]=0,
    # td[else]=smooth_val reduces to:
    #   const_term - (confidence - smooth_val)*x[t] - smooth_val*(row_sum - x[pad])
    row_loss = (const_term
                - (confidence - smooth_val) * x_t
                - smooth_val * (row_sum - x_pad))
    out_ref[...] = jnp.where(tgt == padding_idx, 0.0, row_loss)


def label_smoothing_loss(x, target, *, size, padding_idx, smoothing,
                         row_tile=512):
    """x: (N, size) log-probs (f32 or bf16); target: (N,) ints. Scalar f32."""
    n, v = x.shape
    assert v == size
    assert size > 2, "smoothing/(size-2) requires size > 2"

    itemsize = jnp.dtype(x.dtype).itemsize
    # Cap the row tile so the double-buffered x block stays within ~24 MiB
    # (fits v7x's smaller scoped-VMEM budget); never exceed the row count.
    x_budget = 24 * 1024 * 1024
    max_rows = max(8, ((x_budget // (2 * v * itemsize)) // 8) * 8)
    row_tile = max(8, (min(row_tile, max_rows, _round_up(n, 8)) // 8) * 8)

    n_pad = _round_up(n, row_tile)
    if n_pad != n:
        # Padded rows carry target == padding_idx, so they contribute 0.
        x = jnp.pad(x, ((0, n_pad - n), (0, 0)))
        target = jnp.pad(target, (0, n_pad - n), constant_values=padding_idx)
    tgt2d = target.reshape(n_pad, 1).astype(jnp.int32)

    # Compile-time constants (xlogy semantics: 0*log(0) := 0).
    confidence = 1.0 - smoothing
    smooth_val = smoothing / (size - 2)
    const_term = 0.0
    if confidence > 0.0:
        const_term += confidence * math.log(confidence)
    if smooth_val > 0.0:
        const_term += (size - 2) * smooth_val * math.log(smooth_val)

    kernel = functools.partial(
        _label_smoothing_kernel,
        padding_idx=padding_idx, confidence=confidence,
        smooth_val=smooth_val, const_term=const_term)

    num_tiles = n_pad // row_tile
    # VMEM: double-buffered x block + lane-padded target & output blocks.
    vmem_needed = 2 * row_tile * (v * itemsize + 2 * 128 * 4)
    vmem_limit = int(min(max(vmem_needed + (4 << 20), 16 << 20), 48 << 20))

    per_row = pl.pallas_call(
        kernel,
        out_shape=jax.ShapeDtypeStruct((n_pad, 1), jnp.float32),
        grid_spec=pltpu.PrefetchScalarGridSpec(
            num_scalar_prefetch=0,
            grid=(num_tiles,),
            in_specs=[
                pl.BlockSpec((row_tile, 1), lambda i: (i, 0)),   # target
                pl.BlockSpec((row_tile, v), lambda i: (i, 0)),   # x
            ],
            out_specs=pl.BlockSpec((row_tile, 1), lambda i: (i, 0)),
        ),
        compiler_params=pltpu.CompilerParams(
            dimension_semantics=("parallel",),
            vmem_limit_bytes=vmem_limit),
    )(tgt2d, x)
    # Final reduction over per-row partials (padded rows are exactly 0).
    return jnp.sum(per_row)


def _reference(x, target, *, size, padding_idx, smoothing):
    """Pure-JAX reference mirroring the PyTorch forward (elementwise form)."""
    n, v = x.shape
    confidence = 1.0 - smoothing
    col = jnp.arange(v)[None, :]
    tgt = target[:, None]
    td = jnp.where(col == tgt, confidence, smoothing / (size - 2))
    td = jnp.where(col == padding_idx, 0.0, td)
    td = jnp.where(tgt == padding_idx, 0.0, td)
    safe = jnp.where(td > 0, td, 1.0)
    return jnp.sum(jnp.where(td > 0, td * (jnp.log(safe) - x), 0.0))


if __name__ == "__main__":
    SIZE = 128         # vocab size (x.size(1)) — lane-dense
    PADDING_IDX = 0
    SMOOTHING = 0.1
    N = 64             # number of tokens (batch * seq flattened)

    key = jax.random.PRNGKey(0)
    k1, k2 = jax.random.split(key)

    # x are log-probabilities (log_softmax of random logits)
    logits = jax.random.normal(k1, (N, SIZE), dtype=jnp.float32)
    x = jax.nn.log_softmax(logits, axis=-1)
    # targets, with a couple forced to the padding index
    target = jax.random.randint(k2, (N,), 0, SIZE, dtype=jnp.int32)
    target = target.at[3].set(PADDING_IDX).at[10].set(PADDING_IDX)

    loss = label_smoothing_loss(
        x, target, size=SIZE, padding_idx=PADDING_IDX, smoothing=SMOOTHING)
    loss = jax.block_until_ready(loss)

    ref = _reference(x, target, size=SIZE, padding_idx=PADDING_IDX,
                     smoothing=SMOOTHING)
    assert jnp.allclose(loss, ref, rtol=1e-5, atol=1e-4), (loss, ref)

    print("KERNEL_OK")
</pallas_src>

<mosaic_0001>
module attributes {stable_mosaic.version = 11 : i64} {
  func.func @_label_smoothing_kernel(%arg0: i32, %arg1: memref<64x1xi32, #tpu.memory_space<vmem>>, %arg2: memref<64x128xf32, #tpu.memory_space<vmem>>, %arg3: memref<64x1xf32, #tpu.memory_space<vmem>>) attributes {dimension_semantics = [#tpu.dimension_semantics<parallel>], iteration_bounds = array<i64: 1>, scalar_prefetch = 0 : i64, scratch_operands = 0 : i64, tpu.core_type = #tpu.core_type<tc>, window_params = [{transform_indices = @transform_0, window_bounds = array<i64: 64, 1>}, {transform_indices = @transform_1, window_bounds = array<i64: 64, 128>}, {transform_indices = @transform_2, window_bounds = array<i64: 64, 1>}]} {
    %c0 = arith.constant 0 : index
    %c0_0 = arith.constant 0 : index
    %0 = vector.load %arg2[%c0, %c0_0] : memref<64x128xf32, #tpu.memory_space<vmem>>, vector<64x128xf32>
    %c0_1 = arith.constant 0 : index
    %c0_2 = arith.constant 0 : index
    %1 = vector.load %arg1[%c0_1, %c0_2] : memref<64x1xi32, #tpu.memory_space<vmem>>, vector<64x1xi32>
    %2 = tpu.iota {dimensions = array<i32: 1>} : vector<64x128xi32>
    %3 = vector.broadcast %1 : vector<64x1xi32> to vector<64x128xi32>
    %4 = arith.cmpi eq, %2, %3 : vector<64x128xi32>
    %cst = arith.constant 0.000000e+00 : f32
    %5 = vector.broadcast %cst : f32 to vector<64x128xf32>
    %6 = arith.select %4, %0, %5 : vector<64x128xi1>, vector<64x128xf32>
    %cst_3 = arith.constant dense<0.000000e+00> : vector<64xf32>
    %7 = vector.multi_reduction <add>, %6, %cst_3 [1] : vector<64x128xf32> to vector<64xf32>
    %8 = vector.shape_cast %7 : vector<64xf32> to vector<64x1xf32>
    %cst_4 = arith.constant dense<0.000000e+00> : vector<64xf32>
    %9 = vector.multi_reduction <add>, %0, %cst_4 [1] : vector<64x128xf32> to vector<64xf32>
    %10 = vector.shape_cast %9 : vector<64xf32> to vector<64x1xf32>
    %11 = vector.extract_strided_slice %0 {offsets = [0, 0], sizes = [64, 1], strides = [1, 1]} : vector<64x128xf32> to vector<64x1xf32>
    %cst_5 = arith.constant 0.89920634 : f32
    %12 = vector.broadcast %cst_5 : f32 to vector<64x1xf32>
    %13 = arith.mulf %12, %8 : vector<64x1xf32>
    %cst_6 = arith.constant -0.808711171 : f32
    %14 = vector.broadcast %cst_6 : f32 to vector<64x1xf32>
    %15 = arith.subf %14, %13 : vector<64x1xf32>
    %16 = arith.subf %10, %11 : vector<64x1xf32>
    %cst_7 = arith.constant 7.93650805E-4 : f32
    %17 = vector.broadcast %cst_7 : f32 to vector<64x1xf32>
    %18 = arith.mulf %17, %16 : vector<64x1xf32>
    %19 = arith.subf %15, %18 : vector<64x1xf32>
    %c0_i32 = arith.constant 0 : i32
    %20 = vector.broadcast %c0_i32 : i32 to vector<64x1xi32>
    %21 = arith.cmpi eq, %1, %20 : vector<64x1xi32>
    %cst_8 = arith.constant 0.000000e+00 : f32
    %22 = vector.broadcast %cst_8 : f32 to vector<64x1xf32>
    %23 = arith.select %21, %22, %19 : vector<64x1xi1>, vector<64x1xf32>
    %c0_9 = arith.constant 0 : index
    %c0_10 = arith.constant 0 : index
    %24 = vector.load %arg3[%c0_9, %c0_10] : memref<64x1xf32, #tpu.memory_space<vmem>>, vector<64x1xf32>
    tpu.vector_store %arg3[%c0_9, %c0_10], %23 {strides = array<i32>} : memref<64x1xf32, #tpu.memory_space<vmem>>, vector<64x1xf32>,
    return
  }
  func.func @transform_0(%arg0: i32) -> (i32, i32) {
    %c0_i32 = arith.constant 0 : i32
    %c0_i32_0 = arith.constant 0 : i32
    return %arg0, %c0_i32 : i32, i32
  }
  func.func @transform_1(%arg0: i32) -> (i32, i32) {
    %c0_i32 = arith.constant 0 : i32
    %c0_i32_0 = arith.constant 0 : i32
    return %arg0, %c0_i32 : i32, i32
  }
  func.func @transform_2(%arg0: i32) -> (i32, i32) {
    %c0_i32 = arith.constant 0 : i32
    %c0_i32_0 = arith.constant 0 : i32
    return %arg0, %c0_i32 : i32, i32
  }
}

</mosaic_0001>

<bundles_post_ra>
// kernel: tpu_custom_call.1
= control target key start
LH: loop header
LB: loop body
LE: loop exit
PB: predicated region body
PF: predicated region fallthrough
CT: control target
= control target key end

     0   :  { %v174_v0 = vmov 0   ;;  %v27_v14 = vlaneseq  ;;  %vm157_vm10 = vcmask 7168   ;;  %s332_s0 = inlined_call_operand.vmem [shape: s32[64,1], index: 0, kind: input, shape index: {}]   ;;  %s333_s1 = inlined_call_operand.vmem [shape: f32[64,128], index: 1, kind: input, shape index: {}]   ;;  %s334_s2 = inlined_call_operand.vmem [shape: f32[64,1], index: 2, kind: output, shape index: {}]  }
   0x1   :  { %172 = vset.pattern.permute.xlu1 %v174_v0  ;;  %171 = vset.pattern.permute.xlu0 %v174_v0  ;;  %v193_v1 = vld [vmem:[%s332_s0 + $0x10] sm:$0xff]  ;;  %v198_v2 = vld [vmem:[%s332_s0] sm:$0xff]  ;;  %v211_v4 = vld [vmem:[%s332_s0 + $0x18] sm:$0xff] }
   0x2   :  { %36 = vperm.xlu1 %172, %v193_v1   ;;  %30 = vperm.xlu0 %171, %v198_v2   ;;  %v205_v3 = vld [vmem:[%s332_s0 + $0x20] sm:$0xff]  ;;  %v216_v5 = vld [vmem:[%s332_s0 + $0x8] sm:$0xff]  ;;  %v229_v7 = vld [vmem:[%s332_s0 + $0x38] sm:$0xff]  ;;  %v28_v15 = vand.u32 127, %v27_v14  ;;  %vm143_vm8 = vcmp.eq.s32.totalorder %v193_v1, 0  ;;  %vm141_vm9 = vcmp.eq.s32.totalorder %v198_v2, 0 }
   0x3   :  { %173 = vset.pattern.permute.xlu2 %v174_v0  ;;  %v221_v6 = vld [vmem:[%s332_s0 + $0x28] sm:$0xff]  ;;  %v234_v8 = vld [vmem:[%s332_s0 + $0x30] sm:$0xff]  ;;  %v11_v11 = vld [vmem:[%s333_s1] sm:$0xff]  ;;  %vm144_vm11 = vcmp.eq.s32.totalorder %v211_v4, 0  ;;  %vm142_vm12 = vcmp.eq.s32.totalorder %v216_v5, 0  ;;  %vm145_vm13 = vcmp.eq.s32.totalorder %v205_v3, 0 }
   0x4   :  { %42 = vperm.xlu2 %173, %v205_v3   ;;  %v13_v9 = vld [vmem:[%s333_s1 + $0x10] sm:$0xff]  ;;  %v244_v10 = vld [vmem:[%s333_s1 + $0x8] sm:$0xff]  ;;  %v253_v12 = vld [vmem:[%s333_s1 + $0x20] sm:$0xff]  ;;  %vm147_vm14 = vcmp.eq.s32.totalorder %v234_v8, 0  ;;  %vm148_vm15 = vcmp.eq.s32.totalorder %v229_v7, 0 }
   0x5   :  { %v259_v13 = vld [vmem:[%s333_s1 + $0x18] sm:$0xff]  ;;  %v267_v26 = vld [vmem:[%s333_s1 + $0x28] sm:$0xff]  ;;  %v272_v27 = vld [vmem:[%s333_s1 + $0x30] sm:$0xff] }
   0x6   :  { %v280_v33 = vld [vmem:[%s333_s1 + $0x38] sm:$0xff] }
   0xa   :  { %39 = vperm.xlu1 %172, %v211_v4   ;;  %33 = vperm.xlu0 %171, %v216_v5  }
   0xc   :  { %45 = vperm.xlu2 %173, %v221_v6  }
  0x12   :  { %51 = vperm.xlu1 %172, %v229_v7   ;;  %48 = vperm.xlu0 %171, %v234_v8  }
  0x35   :  { %89 = vadd.xlane.f32.xlu2 %v13_v9 }
  0x3c   :  { %87 = vadd.xlane.f32.xlu1 %v244_v10  ;;  %85 = vadd.xlane.f32.xlu0 %v11_v11 }
  0x44   :  { %93 = vadd.xlane.f32.xlu1 %v253_v12  ;;  %91 = vadd.xlane.f32.xlu0 %v259_v13 }
  0x5e   :  { %v43_v16 = vpop.permute.xlu2 %42 }
  0x5f   :  { %vm57_vm4 = vcmp.eq.s32.totalorder %v28_v15, %v43_v16 }
  0x60   :  { %v65_v29 = vsel %vm57_vm4, %v253_v12, 0.0 }
  0x66   :  { %v46_v25 = vpop.permute.xlu2 %45 }
  0x67   :  { %vm58_vm5 = vcmp.eq.s32.totalorder %v28_v15, %v46_v25 }
  0x68   :  { %v66_v30 = vsel %vm58_vm5, %v267_v26, 0.0 }
  0x74   :  { %v37_v17 = vpop.permute.xlu1 %36  ;;  %v31_v18 = vpop.permute.xlu0 %30 }
  0x75   :  { %vm55_vm0 = vcmp.eq.s32.totalorder %v28_v15, %v37_v17  ;;  %vm53_vm1 = vcmp.eq.s32.totalorder %v28_v15, %v31_v18 }
  0x76   :  { %v63_v19 = vsel %vm55_vm0, %v13_v9, 0.0  ;;  %v61_v20 = vsel %vm53_vm1, %v11_v11, 0.0  ;;  %vm146_vm0 = vcmp.eq.s32.totalorder %v221_v6, 0 }
  0x77   :  { %73 = vadd.xlane.f32.xlu1 %v63_v19  ;;  %69 = vadd.xlane.f32.xlu2 %v61_v20 }
  0x7c   :  { %v40_v21 = vpop.permute.xlu1 %39  ;;  %v34_v22 = vpop.permute.xlu0 %33 }
  0x7d   :  { %vm56_vm2 = vcmp.eq.s32.totalorder %v28_v15, %v40_v21  ;;  %vm54_vm3 = vcmp.eq.s32.totalorder %v28_v15, %v34_v22 }
  0x7e   :  { %v64_v23 = vsel %vm56_vm2, %v259_v13, 0.0  ;;  %v62_v24 = vsel %vm54_vm3, %v244_v10, 0.0 }
  0x7f   :  { %75 = vadd.xlane.f32.xlu2 %v64_v23  ;;  %71 = vadd.xlane.f32.xlu0 %v62_v24 }
  0x84   :  { %v49_v28 = vpop.permute.xlu0 %48  ;;  %v52_v32 = vpop.permute.xlu1 %51 }
  0x85   :  { %vm59_vm6 = vcmp.eq.s32.totalorder %v28_v15, %v49_v28  ;;  %vm60_vm7 = vcmp.eq.s32.totalorder %v28_v15, %v52_v32 }
  0x86   :  { %v67_v31 = vsel %vm59_vm6, %v272_v27, 0.0  ;;  %v68_v34 = vsel %vm60_vm7, %v280_v33, 0.0 }
  0x87   :  { %77 = vadd.xlane.f32.xlu2 %v65_v29  ;;  %79 = vadd.xlane.f32.xlu0 %v66_v30 }
  0x88   :  { %81 = vadd.xlane.f32.xlu1 %v67_v31 }
  0x8f   :  { %83 = vadd.xlane.f32.xlu2 %v68_v34  ;;  %97 = vadd.xlane.f32.xlu0 %v272_v27 }
  0x90   :  { %99 = vadd.xlane.f32.xlu1 %v280_v33 }
  0x97   :  { %95 = vadd.xlane.f32.xlu2 %v267_v26 }
  0xa8   :  { %v90_v37 = vpop.xlane.xlu2 %89 }
  0xa9   :  { %v119_v41 = vsub.f32 %v90_v37, %v13_v9 }
  0xab   :  { %v127_v47 = vmul.f32 0.0007936508, %v119_v41 }
  0xaf   :  { %v88_v35 = vpop.xlane.xlu1 %87  ;;  %v86_v36 = vpop.xlane.xlu0 %85 }
  0xb0   :  { %v117_v39 = vsub.f32 %v86_v36, %v11_v11  ;;  %v118_v53 = vsub.f32 %v88_v35, %v244_v10 }
  0xb2   :  { %v125_v44 = vmul.f32 0.0007936508, %v117_v39  ;;  %v126_v61 = vmul.f32 0.0007936508, %v118_v53 }
  0xb7   :  { %v94_v38 = vpop.xlane.xlu1 %93  ;;  %v92_v40 = vpop.xlane.xlu0 %91 }
  0xb8   :  { %v120_v50 = vsub.f32 %v92_v40, %v259_v13  ;;  %v121_v2 = vsub.f32 %v94_v38, %v253_v12 }
  0xba   :  { %v128_v56 = vmul.f32 0.0007936508, %v120_v50  ;;  %v129_v14 = vmul.f32 0.0007936508, %v121_v2 }
  0xea   :  { %v74_v42 = vpop.xlane.xlu1 %73  ;;  %v70_v43 = vpop.xlane.xlu2 %69 }
  0xeb   :  { %v103_v45 = vmul.f32 0.89920634, %v74_v42  ;;  %v101_v46 = vmul.f32 0.89920634, %v70_v43 }
  0xed   :  { %v111_v48 = vsub.f32 -0.8087112, %v103_v45  ;;  %v109_v49 = vsub.f32 -0.8087112, %v101_v46 }
  0xef   :  { %v135_v51 = vsub.f32 %v111_v48, %v127_v47  ;;  %v133_v52 = vsub.f32 %v109_v49, %v125_v44 }
  0xf1   :  { %v151_v54 = vsel %vm143_vm8, 0.0, %v135_v51  ;;  %v149_v55 = vsel %vm141_vm9, 0.0, %v133_v52 }
  0xf2   :  { %160 = vst.msk [vmem:[%s334_s2 + $0x10] sm:$0xff] %vm157_vm10, %v151_v54  ;;  %v76_v57 = vpop.xlane.xlu2 %75  ;;  %v72_v58 = vpop.xlane.xlu0 %71 }
  0xf3   :  { %158 = vst.msk [vmem:[%s334_s2] sm:$0xff] %vm157_vm10, %v149_v55  ;;  %v104_v59 = vmul.f32 0.89920634, %v76_v57  ;;  %v102_v60 = vmul.f32 0.89920634, %v72_v58 }
  0xf5   :  { %v112_v62 = vsub.f32 -0.8087112, %v104_v59  ;;  %v110_v63 = vsub.f32 -0.8087112, %v102_v60 }
  0xf7   :  { %v136_v0 = vsub.f32 %v112_v62, %v128_v56  ;;  %v134_v1 = vsub.f32 %v110_v63, %v126_v61 }
  0xf9   :  { %v152_v9 = vsel %vm144_vm11, 0.0, %v136_v0  ;;  %v150_v10 = vsel %vm142_vm12, 0.0, %v134_v1 }
  0xfa   :  { %161 = vst.msk [vmem:[%s334_s2 + $0x18] sm:$0xff] %vm157_vm10, %v152_v9  ;;  %v78_v11 = vpop.xlane.xlu2 %77  ;;  %v80_v13 = vpop.xlane.xlu0 %79 }
  0xfb   :  { %159 = vst.msk [vmem:[%s334_s2 + $0x8] sm:$0xff] %vm157_vm10, %v150_v10  ;;  %v105_v4 = vmul.f32 0.89920634, %v78_v11  ;;  %v82_v5 = vpop.xlane.xlu1 %81  ;;  %v106_v31 = vmul.f32 0.89920634, %v80_v13 }
  0xfc   :  { %v107_v17 = vmul.f32 0.89920634, %v82_v5 }
  0xfd   :  { %v113_v15 = vsub.f32 -0.8087112, %v105_v4 }
  0xfe   :  { %v115_v24 = vsub.f32 -0.8087112, %v107_v17 }
  0xff   :  { %v137_v12 = vsub.f32 %v113_v15, %v129_v14 }
 0x101   :  { %v153_v16 = vsel %vm145_vm13, 0.0, %v137_v12 }
 0x102   :  { %162 = vst.msk [vmem:[%s334_s2 + $0x20] sm:$0xff] %vm157_vm10, %v153_v16  ;;  %v84_v18 = vpop.xlane.xlu2 %83  ;;  %v98_v19 = vpop.xlane.xlu0 %97 }
 0x103   :  { %v108_v20 = vmul.f32 0.89920634, %v84_v18  ;;  %v100_v21 = vpop.xlane.xlu1 %99  ;;  %v123_v22 = vsub.f32 %v98_v19, %v272_v27 }
 0x104   :  { %v124_v23 = vsub.f32 %v100_v21, %v280_v33  ;;  %v114_v33 = vsub.f32 -0.8087112, %v106_v31 }
 0x105   :  { %v116_v25 = vsub.f32 -0.8087112, %v108_v20  ;;  %v131_v28 = vmul.f32 0.0007936508, %v123_v22 }
 0x106   :  { %v132_v3 = vmul.f32 0.0007936508, %v124_v23 }
 0x107   :  { %v139_v29 = vsub.f32 %v115_v24, %v131_v28 }
 0x108   :  { %v140_v30 = vsub.f32 %v116_v25, %v132_v3 }
 0x109   :  { %v155_v32 = vsel %vm147_vm14, 0.0, %v139_v29 }
 0x10a   :  { %v156_v34 = vsel %vm148_vm15, 0.0, %v140_v30  ;;  %164 = vst.msk [vmem:[%s334_s2 + $0x30] sm:$0xff] %vm157_vm10, %v155_v32  ;;  %v96_v27 = vpop.xlane.xlu2 %95 }
 0x10b   :  { %165 = vst.msk [vmem:[%s334_s2 + $0x38] sm:$0xff] %vm157_vm10, %v156_v34  ;;  %v122_v8 = vsub.f32 %v96_v27, %v267_v26 }
 0x10d   :  { %v130_v7 = vmul.f32 0.0007936508, %v122_v8 }
 0x10f   :  { %v138_v35 = vsub.f32 %v114_v33, %v130_v7 }
 0x111   :  { %v154_v36 = vsel %vm146_vm0, 0.0, %v138_v35 }
 0x112   :  { %163 = vst.msk [vmem:[%s334_s2 + $0x28] sm:$0xff] %vm157_vm10, %v154_v36 }

</bundles_post_ra>
